<compile_context>
chip_gen: v7x
topology: tpu7x:2x2x1
jax: 0.10.0
libtpu: 0.0.40
codegen_flags: <defaults>
</compile_context>

<pallas_src>
import jax
import jax.numpy as jnp
from jax.experimental import pallas as pl
from jax.experimental.pallas import tpu as pltpu


_NEG = -1.0e30  # class-padding value for logits (finite, so 0 * pad == 0)


def _round_up(x, m):
    return ((x + m - 1) // m) * m


def _dce_kernel(logits_ref, labels_ref, out_ref, m_ref, s_ref, sy_ref, syx_ref):
    """Online-logsumexp dense cross entropy over one (tile_b, tile_c) block."""
    j = pl.program_id(1)  # class-tile index (reduction axis, innermost)

    @pl.when(j == 0)
    def _init():
        m_ref[...] = jnp.full_like(m_ref, -jnp.inf)
        s_ref[...] = jnp.zeros_like(s_ref)
        sy_ref[...] = jnp.zeros_like(sy_ref)
        syx_ref[...] = jnp.zeros_like(syx_ref)

    x = logits_ref[...].astype(jnp.float32)  # (tile_b, tile_c)
    y = labels_ref[...].astype(jnp.float32)  # (tile_b, tile_c)

    # streaming logsumexp state update
    m_prev = m_ref[...]
    m_new = jnp.maximum(m_prev, jnp.max(x, axis=-1, keepdims=True))
    alpha = jnp.exp(m_prev - m_new)
    s_ref[...] = s_ref[...] * alpha + jnp.sum(jnp.exp(x - m_new), axis=-1,
                                              keepdims=True)
    m_ref[...] = m_new

    # weighted-sum state (loss_row = sum(y)*lse - sum(y*x); no logprobs temps)
    sy_ref[...] += jnp.sum(y, axis=-1, keepdims=True)
    syx_ref[...] += jnp.sum(y * x, axis=-1, keepdims=True)

    @pl.when(j == pl.num_programs(1) - 1)
    def _finalize():
        lse = m_ref[...] + jnp.log(s_ref[...])          # (tile_b, 1)
        row_loss = sy_ref[...] * lse - syx_ref[...]     # (tile_b, 1)
        out_ref[0, 0] = jnp.sum(row_loss)               # partial of this batch tile


def dense_cross_entropy(logits, labels, *, tile_b=None, tile_c=None,
                        vmem_limit_bytes=48 * 1024 * 1024,
                        block_budget_bytes=24 * 1024 * 1024):
    """Pallas TPU implementation of DenseCrossEntropy.forward.

    logits, labels: (B, C) arrays (any float dtype; cast to f32 in-kernel, so
    feeding bf16 halves HBM traffic with identical f32 math). Returns scalar
    f32 loss = mean over rows of -sum(labels * log_softmax(logits), -1).
    """
    B, C = logits.shape
    assert labels.shape == (B, C), (logits.shape, labels.shape)

    itemsize = max(jnp.dtype(logits.dtype).itemsize,
                   jnp.dtype(labels.dtype).itemsize)
    sub = 8 if itemsize >= 4 else (16 if itemsize == 2 else 32)

    # --- class tiling: lane-dense multiple of 128, capped at 2048 lanes ---
    if tile_c is None:
        c128 = _round_up(C, 128) // 128
        tile_c = 128
        for d in range(min(c128, 16), 0, -1):
            if c128 % d == 0:
                tile_c = 128 * d
                break
    assert tile_c % 128 == 0
    Cp = _round_up(C, tile_c)
    n_ct = Cp // tile_c

    # --- batch tiling: largest tile under the in-flight VMEM block budget
    # (2 inputs x 2 pipeline buffers), conservative for v7x's 64 MiB VMEM ---
    if tile_b is None:
        tb = block_budget_bytes // (2 * 2 * tile_c * itemsize)
        tile_b = max(sub, min(1024, (tb // sub) * sub))
    assert tile_b % sub == 0
    tile_b = min(tile_b, _round_up(B, sub))
    Bp = _round_up(B, tile_b)
    n_bt = Bp // tile_b

    # --- pad to the tiled shape: class pad = large-negative logits / zero
    # labels; batch pad = zero rows (sum(labels)==0 -> zero loss contribution)
    if Cp > C:
        logits = jnp.pad(logits, ((0, 0), (0, Cp - C)), constant_values=_NEG)
        labels = jnp.pad(labels, ((0, 0), (0, Cp - C)))
    if Bp > B:
        logits = jnp.pad(logits, ((0, Bp - B), (0, 0)))
        labels = jnp.pad(labels, ((0, Bp - B), (0, 0)))

    partials = pl.pallas_call(
        _dce_kernel,
        out_shape=jax.ShapeDtypeStruct((n_bt, 1), jnp.float32),
        grid_spec=pltpu.PrefetchScalarGridSpec(
            num_scalar_prefetch=0,
            grid=(n_bt, n_ct),
            in_specs=[
                pl.BlockSpec((tile_b, tile_c), lambda i, j: (i, j)),
                pl.BlockSpec((tile_b, tile_c), lambda i, j: (i, j)),
            ],
            out_specs=pl.BlockSpec((1, 1), lambda i, j: (i, 0),
                                   memory_space=pltpu.SMEM),
            scratch_shapes=[pltpu.VMEM((tile_b, 1), jnp.float32)] * 4,
        ),
        compiler_params=pltpu.CompilerParams(
            dimension_semantics=("parallel", "arbitrary"),
            vmem_limit_bytes=vmem_limit_bytes,
        ),
        cost_estimate=pl.CostEstimate(
            flops=5 * Bp * Cp,
            transcendentals=Bp * Cp,
            bytes_accessed=2 * Bp * Cp * itemsize + 4 * n_bt,
        ),
    )(logits, labels)

    # tiny finish: per-batch-tile partials -> mean over the ORIGINAL B rows
    return jnp.sum(partials) / jnp.float32(B)


if __name__ == "__main__":
    key = jax.random.PRNGKey(0)
    k1, k2, k3, k4 = jax.random.split(key, 4)

    def reference(lg, lb):
        lp = jax.nn.log_softmax(lg.astype(jnp.float32), axis=-1)
        return jnp.mean(jnp.sum(-lb.astype(jnp.float32) * lp, axis=-1))

    # --- test 1: small f32 inputs (B=16, C=32), single-tile grid ---
    B, C = 16, 32
    logits = jax.random.normal(k1, (B, C), dtype=jnp.float32)
    raw = jax.random.uniform(k2, (B, C), dtype=jnp.float32)
    labels = raw / jnp.sum(raw, axis=-1, keepdims=True)

    loss = jax.block_until_ready(dense_cross_entropy(logits, labels))
    loss_ref = reference(logits, labels)
    assert jnp.allclose(loss, loss_ref, rtol=1e-5, atol=1e-5), (loss, loss_ref)

    # --- test 2: bf16 inputs, ragged B/C, forced multi-tile grid (exercises
    # batch-row padding, lane padding, and online logsumexp across class tiles)
    B2, C2 = 24, 200
    logits2 = jax.random.normal(k3, (B2, C2), dtype=jnp.bfloat16)
    raw2 = jax.random.uniform(k4, (B2, C2), dtype=jnp.float32)
    labels2 = (raw2 / jnp.sum(raw2, axis=-1, keepdims=True)).astype(jnp.bfloat16)

    loss2 = jax.block_until_ready(
        dense_cross_entropy(logits2, labels2, tile_b=16, tile_c=128))
    loss2_ref = reference(logits2, labels2)
    assert jnp.allclose(loss2, loss2_ref, rtol=1e-4, atol=1e-4), (loss2, loss2_ref)

    print("KERNEL_OK")
</pallas_src>

<mosaic_0001>
module attributes {stable_mosaic.version = 11 : i64} {
  func.func @_dce_kernel(%arg0: i32, %arg1: i32, %arg2: memref<16x128xf32, #tpu.memory_space<vmem>>, %arg3: memref<16x128xf32, #tpu.memory_space<vmem>>, %arg4: memref<1x1xf32, #tpu.memory_space<smem>>, %arg5: memref<16x1xf32, #tpu.memory_space<vmem>>, %arg6: memref<16x1xf32, #tpu.memory_space<vmem>>, %arg7: memref<16x1xf32, #tpu.memory_space<vmem>>, %arg8: memref<16x1xf32, #tpu.memory_space<vmem>>) attributes {dimension_semantics = [#tpu.dimension_semantics<parallel>, #tpu.dimension_semantics<arbitrary>], iteration_bounds = array<i64: 1, 1>, scalar_prefetch = 0 : i64, scratch_operands = 4 : i64, tpu.core_type = #tpu.core_type<tc>, window_params = [{transform_indices = @transform_0, window_bounds = array<i64: 16, 128>}, {transform_indices = @transform_1, window_bounds = array<i64: 16, 128>}, {transform_indices = @transform_2, window_bounds = array<i64: 1, 1>}]} {
    %c0_i32 = arith.constant 0 : i32
    %0 = arith.cmpi eq, %arg1, %c0_i32 : i32
    %1 = arith.extui %0 : i1 to i32
    %c0_i32_0 = arith.constant 0 : i32
    %2 = arith.cmpi ne, %1, %c0_i32_0 : i32
    scf.if %2 {
      %cst_25 = arith.constant 0xFF800000 : f32
      %35 = vector.broadcast %cst_25 : f32 to vector<16x1xf32>
      %c0_26 = arith.constant 0 : index
      %c0_27 = arith.constant 0 : index
      %36 = vector.load %arg5[%c0_26, %c0_27] : memref<16x1xf32, #tpu.memory_space<vmem>>, vector<16x1xf32>
      tpu.vector_store %arg5[%c0_26, %c0_27], %35 {strides = array<i32>} : memref<16x1xf32, #tpu.memory_space<vmem>>, vector<16x1xf32>,
      %cst_28 = arith.constant 0.000000e+00 : f32
      %37 = vector.broadcast %cst_28 : f32 to vector<16x1xf32>
      %c0_29 = arith.constant 0 : index
      %c0_30 = arith.constant 0 : index
      %38 = vector.load %arg6[%c0_29, %c0_30] : memref<16x1xf32, #tpu.memory_space<vmem>>, vector<16x1xf32>
      tpu.vector_store %arg6[%c0_29, %c0_30], %37 {strides = array<i32>} : memref<16x1xf32, #tpu.memory_space<vmem>>, vector<16x1xf32>,
      %cst_31 = arith.constant 0.000000e+00 : f32
      %39 = vector.broadcast %cst_31 : f32 to vector<16x1xf32>
      %c0_32 = arith.constant 0 : index
      %c0_33 = arith.constant 0 : index
      %40 = vector.load %arg7[%c0_32, %c0_33] : memref<16x1xf32, #tpu.memory_space<vmem>>, vector<16x1xf32>
      tpu.vector_store %arg7[%c0_32, %c0_33], %39 {strides = array<i32>} : memref<16x1xf32, #tpu.memory_space<vmem>>, vector<16x1xf32>,
      %cst_34 = arith.constant 0.000000e+00 : f32
      %41 = vector.broadcast %cst_34 : f32 to vector<16x1xf32>
      %c0_35 = arith.constant 0 : index
      %c0_36 = arith.constant 0 : index
      %42 = vector.load %arg8[%c0_35, %c0_36] : memref<16x1xf32, #tpu.memory_space<vmem>>, vector<16x1xf32>
      tpu.vector_store %arg8[%c0_35, %c0_36], %41 {strides = array<i32>} : memref<16x1xf32, #tpu.memory_space<vmem>>, vector<16x1xf32>,
    } else {
    }
    %c0 = arith.constant 0 : index
    %c0_1 = arith.constant 0 : index
    %3 = vector.load %arg2[%c0, %c0_1] : memref<16x128xf32, #tpu.memory_space<vmem>>, vector<16x128xf32>
    %c0_2 = arith.constant 0 : index
    %c0_3 = arith.constant 0 : index
    %4 = vector.load %arg3[%c0_2, %c0_3] : memref<16x128xf32, #tpu.memory_space<vmem>>, vector<16x128xf32>
    %c0_4 = arith.constant 0 : index
    %c0_5 = arith.constant 0 : index
    %5 = vector.load %arg5[%c0_4, %c0_5] : memref<16x1xf32, #tpu.memory_space<vmem>>, vector<16x1xf32>
    %cst = arith.constant dense<0xFF800000> : vector<16xf32>
    %6 = vector.multi_reduction <maximumf>, %3, %cst [1] : vector<16x128xf32> to vector<16xf32>
    %7 = vector.shape_cast %6 : vector<16xf32> to vector<16x1xf32>
    %8 = arith.maximumf %5, %7 : vector<16x1xf32>
    %9 = arith.subf %5, %8 : vector<16x1xf32>
    %10 = math.exp %9 : vector<16x1xf32>
    %c0_6 = arith.constant 0 : index
    %c0_7 = arith.constant 0 : index
    %11 = vector.load %arg6[%c0_6, %c0_7] : memref<16x1xf32, #tpu.memory_space<vmem>>, vector<16x1xf32>
    %12 = arith.mulf %11, %10 : vector<16x1xf32>
    %13 = vector.broadcast %8 : vector<16x1xf32> to vector<16x128xf32>
    %14 = arith.subf %3, %13 : vector<16x128xf32>
    %15 = math.exp %14 : vector<16x128xf32>
    %cst_8 = arith.constant dense<0.000000e+00> : vector<16xf32>
    %16 = vector.multi_reduction <add>, %15, %cst_8 [1] : vector<16x128xf32> to vector<16xf32>
    %17 = vector.shape_cast %16 : vector<16xf32> to vector<16x1xf32>
    %18 = arith.addf %12, %17 : vector<16x1xf32>
    %c0_9 = arith.constant 0 : index
    %c0_10 = arith.constant 0 : index
    %19 = vector.load %arg6[%c0_9, %c0_10] : memref<16x1xf32, #tpu.memory_space<vmem>>, vector<16x1xf32>
    tpu.vector_store %arg6[%c0_9, %c0_10], %18 {strides = array<i32>} : memref<16x1xf32, #tpu.memory_space<vmem>>, vector<16x1xf32>,
    %c0_11 = arith.constant 0 : index
    %c0_12 = arith.constant 0 : index
    %20 = vector.load %arg5[%c0_11, %c0_12] : memref<16x1xf32, #tpu.memory_space<vmem>>, vector<16x1xf32>
    tpu.vector_store %arg5[%c0_11, %c0_12], %8 {strides = array<i32>} : memref<16x1xf32, #tpu.memory_space<vmem>>, vector<16x1xf32>,
    %c0_13 = arith.constant 0 : index
    %c0_14 = arith.constant 0 : index
    %21 = vector.load %arg7[%c0_13, %c0_14] : memref<16x1xf32, #tpu.memory_space<vmem>>, vector<16x1xf32>
    %cst_15 = arith.constant dense<0.000000e+00> : vector<16xf32>
    %22 = vector.multi_reduction <add>, %4, %cst_15 [1] : vector<16x128xf32> to vector<16xf32>
    %23 = vector.shape_cast %22 : vector<16xf32> to vector<16x1xf32>
    %24 = arith.addf %21, %23 : vector<16x1xf32>
    %c0_16 = arith.constant 0 : index
    %c0_17 = arith.constant 0 : index
    %25 = vector.load %arg7[%c0_16, %c0_17] : memref<16x1xf32, #tpu.memory_space<vmem>>, vector<16x1xf32>
    tpu.vector_store %arg7[%c0_16, %c0_17], %24 {strides = array<i32>} : memref<16x1xf32, #tpu.memory_space<vmem>>, vector<16x1xf32>,
    %c0_18 = arith.constant 0 : index
    %c0_19 = arith.constant 0 : index
    %26 = vector.load %arg8[%c0_18, %c0_19] : memref<16x1xf32, #tpu.memory_space<vmem>>, vector<16x1xf32>
    %27 = arith.mulf %4, %3 : vector<16x128xf32>
    %cst_20 = arith.constant dense<0.000000e+00> : vector<16xf32>
    %28 = vector.multi_reduction <add>, %27, %cst_20 [1] : vector<16x128xf32> to vector<16xf32>
    %29 = vector.shape_cast %28 : vector<16xf32> to vector<16x1xf32>
    %30 = arith.addf %26, %29 : vector<16x1xf32>
    %c0_21 = arith.constant 0 : index
    %c0_22 = arith.constant 0 : index
    %31 = vector.load %arg8[%c0_21, %c0_22] : memref<16x1xf32, #tpu.memory_space<vmem>>, vector<16x1xf32>
    tpu.vector_store %arg8[%c0_21, %c0_22], %30 {strides = array<i32>} : memref<16x1xf32, #tpu.memory_space<vmem>>, vector<16x1xf32>,
    %c0_i32_23 = arith.constant 0 : i32
    %32 = arith.cmpi eq, %arg1, %c0_i32_23 : i32
    %33 = arith.extui %32 : i1 to i32
    %c0_i32_24 = arith.constant 0 : i32
    %34 = arith.cmpi ne, %33, %c0_i32_24 : i32
    scf.if %34 {
      %c0_25 = arith.constant 0 : index
      %c0_26 = arith.constant 0 : index
      %35 = vector.load %arg5[%c0_25, %c0_26] : memref<16x1xf32, #tpu.memory_space<vmem>>, vector<16x1xf32>
      %c0_27 = arith.constant 0 : index
      %c0_28 = arith.constant 0 : index
      %36 = vector.load %arg6[%c0_27, %c0_28] : memref<16x1xf32, #tpu.memory_space<vmem>>, vector<16x1xf32>
      %37 = math.log %36 : vector<16x1xf32>
      %38 = arith.addf %35, %37 : vector<16x1xf32>
      %c0_29 = arith.constant 0 : index
      %c0_30 = arith.constant 0 : index
      %39 = vector.load %arg7[%c0_29, %c0_30] : memref<16x1xf32, #tpu.memory_space<vmem>>, vector<16x1xf32>
      %40 = arith.mulf %39, %38 : vector<16x1xf32>
      %c0_31 = arith.constant 0 : index
      %c0_32 = arith.constant 0 : index
      %41 = vector.load %arg8[%c0_31, %c0_32] : memref<16x1xf32, #tpu.memory_space<vmem>>, vector<16x1xf32>
      %42 = arith.subf %40, %41 : vector<16x1xf32>
      %43 = vector.shape_cast %42 : vector<16x1xf32> to vector<1x16x1xf32>
      %cst_33 = arith.constant dense<0.000000e+00> : vector<1xf32>
      %44 = vector.multi_reduction <add>, %43, %cst_33 [1, 2] : vector<1x16x1xf32> to vector<1xf32>
      %45 = vector.shape_cast %44 : vector<1xf32> to vector<1x1x1xf32>
      %46 = vector.extract %45[0, 0, 0] : f32 from vector<1x1x1xf32>
      %c0_34 = arith.constant 0 : index
      %c0_35 = arith.constant 0 : index
      %47 = memref.load %arg4[%c0_34, %c0_35] : memref<1x1xf32, #tpu.memory_space<smem>>
      memref.store %46, %arg4[%c0_34, %c0_35] : memref<1x1xf32, #tpu.memory_space<smem>>
    } else {
    }
    return
  }
  func.func @transform_0(%arg0: i32, %arg1: i32) -> (i32, i32) {
    %c0_i32 = arith.constant 0 : i32
    return %arg0, %arg1 : i32, i32
  }
  func.func @transform_1(%arg0: i32, %arg1: i32) -> (i32, i32) {
    %c0_i32 = arith.constant 0 : i32
    return %arg0, %arg1 : i32, i32
  }
  func.func @transform_2(%arg0: i32, %arg1: i32) -> (i32, i32) {
    %c0_i32 = arith.constant 0 : i32
    %c0_i32_0 = arith.constant 0 : i32
    return %arg0, %c0_i32 : i32, i32
  }
}

</mosaic_0001>

<bundles_post_ra>
// kernel: tpu_custom_call.1
= control target key start
LH: loop header
LB: loop body
LE: loop exit
PB: predicated region body
PF: predicated region fallthrough
CT: control target
= control target key end

     0   :  { %7 = vsyncpa [#allocation7], 0  ;;  %s335_s0 = inlined_call_operand.hbm [shape: f32[16,128], index: 0, kind: input, shape index: {}]   ;;  %s336_s1 = inlined_call_operand.hbm [shape: f32[16,128], index: 1, kind: input, shape index: {}]   ;;  %s337_s2 = inlined_call_operand.hbm [shape: f32[1,1], index: 2, kind: output, shape index: {}]  }
   0x1   :  { %8 = vsyncpa [#allocation10], 0 }
   0x2   :  { %9 = vsyncpa [#allocation8], 0  ;;  %s258_s9 = smov [#allocation6]   ;;  %s198_s13 = scalar_lea.hbm %s335_s0, 256 }
   0x3   :  { %s15_s10 = sshll.u32 %s258_s9, 4  ;;  %p199_p0 = scmp.ne.s32.totalorder %s335_s0, %s198_s13  ;;  %s16_s10 = int_to_ptr.vmem [resolvable:$true] %s15_s10 }
   0x4   :  { %p202_p1 = scmp.lt.u32.totalorder %s198_s13, %s335_s0 }
   0x6   :  { %p204_p2 = pnand %p202_p1, %p199_p0 }
   0x8   :  { %207 = shalt.err (!%p204_p2)
}
   0x9   :  { %s208_s18 = scalar_lea.vmem %s16_s10, 256  ;;  %p213_p4 = scmp.lt.s32.totalorder %s16_s10, %s16_s10 }
   0xa   :  { %p209_p3 = scmp.ne.s32.totalorder %s16_s10, %s208_s18  ;;  %p214_p5 = scmp.lt.s32.totalorder %s208_s18, %s208_s18 }
   0xc   :  { %p215_p6 = por %p214_p5, %p213_p4 }
   0xe   :  { %p216_p7 = pnand %p215_p6, %p209_p3 }
  0x10   :  { %219 = shalt.err (!%p216_p7)
}
  0x11   :  { %s259_s19 = smov 128   ;;  %s260_s20 = smov 8  }
  0x12   :  { %21 = dma.hbm_to_vmem [thread:$0]  %s335_s0, 256, %s16_s10, [#allocation7], %s259_s19, %s259_s19, %s260_s20  }
  0x13   :  { %s261_s23 = smov [#allocation9]   ;;  %s220_s27 = scalar_lea.hbm %s336_s1, 256 }
  0x14   :  { %s27_s24 = sshll.u32 %s261_s23, 4  ;;  %p221_p8 = scmp.ne.s32.totalorder %s336_s1, %s220_s27  ;;  %s28_s24 = int_to_ptr.vmem [resolvable:$true] %s27_s24 }
  0x15   :  { %p224_p9 = scmp.lt.u32.totalorder %s220_s27, %s336_s1 }
  0x17   :  { %p226_p10 = pnand %p224_p9, %p221_p8 }
  0x19   :  { %229 = shalt.err (!%p226_p10)
}
  0x1a   :  { %s230_s4 = scalar_lea.vmem %s28_s24, 256  ;;  %p235_p12 = scmp.lt.s32.totalorder %s28_s24, %s28_s24 }
  0x1b   :  { %p231_p11 = scmp.ne.s32.totalorder %s28_s24, %s230_s4  ;;  %p236_p13 = scmp.lt.s32.totalorder %s230_s4, %s230_s4 }
  0x1d   :  { %p237_p0 = por %p236_p13, %p235_p12 }
  0x1f   :  { %p238_p1 = pnand %p237_p0, %p231_p11 }
  0x21   :  { %241 = shalt.err (!%p238_p1)
}
  0x22   :  { %33 = dma.hbm_to_vmem [thread:$0]  %s336_s1, 256, %s28_s24, [#allocation10], %s259_s19, %s259_s19, %s260_s20  }
  0x23   :  { %252 = dma.done.wait [#allocation7], 256  }
  0x24   :  { %253 = vsyncadd [#allocation7], 4294967040 }
  0x25   :  { %254 = dma.done.wait [#allocation10], 256  }
  0x26   :  { %255 = vsyncadd [#allocation10], 4294967040  ;;  %vm44_vm0 = vcmask 7168   ;;  %v262_v0 = vmov -inf   ;;  %v53_v1 = vld [vmem:[#allocation6] sm:$0xff]  ;;  %v54_v2 = vld [vmem:[#allocation6 + $0x8] sm:$0xff] }
  0x27   :  { %45 = vst.msk [vmem:[#allocation2] sm:$0xff] %vm44_vm0, %v262_v0  ;;  %46 = vst.msk [vmem:[#allocation2 + $0x8] sm:$0xff] %vm44_vm0, %v262_v0  ;;  %59 = vmax.xlane.f32.xlu0 %v53_v1  ;;  %v263_v3 = vmov 0   ;;  %v264_v4 = vmov 0.0   ;;  %v55_v20 = vld [vmem:[#allocation9] sm:$0xff]  ;;  %v56_v22 = vld [vmem:[#allocation9 + $0x8] sm:$0xff] }
  0x28   :  { %184 = vset.pattern.permute.xlu1 %v263_v3  ;;  %185 = vset.pattern.permute.xlu0 %v263_v3  ;;  %47 = vst.msk [vmem:[#allocation3] sm:$0xff] %vm44_vm0, %v264_v4  ;;  %48 = vst.msk [vmem:[#allocation3 + $0x8] sm:$0xff] %vm44_vm0, %v264_v4  ;;  %v114_v23 = vmul.f32 %v55_v20, %v53_v1  ;;  %v115_v24 = vmul.f32 %v56_v22, %v54_v2  ;;  %s242_s8 = scalar_lea.hbm %s337_s2, 16 }
  0x29   :  { %49 = vst.msk [vmem:[#allocation4] sm:$0xff] %vm44_vm0, %v264_v4  ;;  %50 = vst.msk [vmem:[#allocation4 + $0x8] sm:$0xff] %vm44_vm0, %v264_v4  ;;  %p243_p2 = scmp.ne.s32.totalorder %s337_s2, %s242_s8  ;;  %p246_p3 = scmp.lt.u32.totalorder %s242_s8, %s337_s2 }
  0x2a   :  { %51 = vst.msk [vmem:[#allocation5] sm:$0xff] %vm44_vm0, %v264_v4  ;;  %52 = vst.msk [vmem:[#allocation5 + $0x8] sm:$0xff] %vm44_vm0, %v264_v4 }
  0x2b   :  { %61 = vmax.xlane.f32.xlu0 %v54_v2  ;;  %p248_p4 = pnand %p246_p3, %p243_p2 }
  0x2e   :  { %v57_v5 = vld [vmem:[#allocation2] sm:$0xff]  ;;  %v58_v8 = vld [vmem:[#allocation2 + $0x8] sm:$0xff] }
  0x2f   :  { %v71_v28 = vld [vmem:[#allocation3] sm:$0xff]  ;;  %v72_v32 = vld [vmem:[#allocation3 + $0x8] sm:$0xff] }
  0x30   :  { %v102_v34 = vld [vmem:[#allocation4] sm:$0xff]  ;;  %v103_v40 = vld [vmem:[#allocation4 + $0x8] sm:$0xff] }
  0x31   :  { %v112_v43 = vld [vmem:[#allocation5] sm:$0xff]  ;;  %v113_v47 = vld [vmem:[#allocation5 + $0x8] sm:$0xff] }
  0xb4   :  { %v60_v6 = vpop.xlane.xlu0 %59 }
  0xb5   :  { %v63_v7 = vmax.f32 %v57_v5, %v60_v6 }
  0xb7   :  { %v65_v9 = vsub.f32 %v57_v5, %v63_v7  ;;  %100 = vst.msk [vmem:[#allocation2] sm:$0xff] %vm44_vm0, %v63_v7  ;;  %77 = vperm.xlu1 %184, %v63_v7  }
  0xb8   :  { %v62_v10 = vpop.xlane.xlu0 %61 }
  0xb9   :  { %v64_v11 = vmax.f32 %v58_v8, %v62_v10  ;;  %v67_v25 = vmul.f32 1.442695, %v65_v9 }
  0xbb   :  { %v66_v12 = vsub.f32 %v58_v8, %v64_v11  ;;  %101 = vst.msk [vmem:[#allocation2 + $0x8] sm:$0xff] %vm44_vm0, %v64_v11  ;;  %82 = vperm.xlu1 %184, %v64_v11  }
  0xbd   :  { %v69_v26 = vmul.f32 1.442695, %v66_v12 }
  0xbe   :  { %v127_v53 = vld [vmem:[#allocation2] sm:$0xff] }
  0xc2   :  { %v128_v59 = vld [vmem:[#allocation2 + $0x8] sm:$0xff] }
 0x136   :  { %v78_v13 = vpop.permute.xlu1 %77 }
 0x137   :  { %v85_v14 = vsub.f32 %v53_v1, %v78_v13 }
 0x139   :  { %v87_v15 = vmul.f32 1.442695, %v85_v14 }
 0x13a   :  { %v83_v16 = vpop.permute.xlu1 %82 }
 0x13b   :  { %186 = vpow2.f32 %v87_v15  ;;  %v86_v17 = vsub.f32 %v54_v2, %v83_v16 }
 0x13d   :  { %v89_v18 = vmul.f32 1.442695, %v86_v17 }
 0x13f   :  { %188 = vpow2.f32 %v89_v18 }
 0x140   :  { %190 = vpow2.f32 %v67_v25 }
 0x141   :  { %192 = vpow2.f32 %v69_v26 }
 0x145   :  { %v187_v19 = vpop.eup %186 }
 0x146   :  { %91 = vadd.xlane.f32.xlu0 %v187_v19 }
 0x149   :  { %v189_v21 = vpop.eup %188 }
 0x14a   :  { %93 = vadd.xlane.f32.xlu1 %v189_v21  ;;  %104 = vadd.xlane.f32.xlu0 %v55_v20  ;;  %v191_v27 = vpop.eup %190 }
 0x14b   :  { %v73_v29 = vmul.f32 %v191_v27, %v71_v28  ;;  %v193_v30 = vpop.eup %192 }
 0x14c   :  { %v74_v35 = vmul.f32 %v193_v30, %v72_v32 }
 0x14e   :  { %106 = vadd.xlane.f32.xlu0 %v56_v22 }
 0x152   :  { %116 = vadd.xlane.f32.xlu0 %v114_v23 }
 0x156   :  { %118 = vadd.xlane.f32.xlu0 %v115_v24 }
 0x1d3   :  { %v92_v31 = vpop.xlane.xlu0 %91 }
 0x1d4   :  { %v95_v33 = vadd.f32 %v92_v31, %v73_v29 }
 0x1d6   :  { %98 = vst.msk [vmem:[#allocation3] sm:$0xff] %vm44_vm0, %v95_v33 }
 0x1d7   :  { %v94_v36 = vpop.xlane.xlu1 %93  ;;  %v105_v37 = vpop.xlane.xlu0 %104 }
 0x1d8   :  { %v96_v38 = vadd.f32 %v94_v36, %v74_v35  ;;  %v108_v39 = vadd.f32 %v105_v37, %v102_v34 }
 0x1da   :  { %99 = vst.msk [vmem:[#allocation3 + $0x8] sm:$0xff] %vm44_vm0, %v96_v38  ;;  %110 = vst.msk [vmem:[#allocation4] sm:$0xff] %vm44_vm0, %v108_v39 }
 0x1db   :  { %v107_v41 = vpop.xlane.xlu0 %106 }
 0x1dc   :  { %v109_v42 = vadd.f32 %v107_v41, %v103_v40 }
 0x1dd   :  { %v129_v44 = vld [vmem:[#allocation3] sm:$0xff] }
 0x1de   :  { %111 = vst.msk [vmem:[#allocation4 + $0x8] sm:$0xff] %vm44_vm0, %v109_v42  ;;  %194 = vlog2.f32 %v129_v44 }
 0x1df   :  { %v117_v45 = vpop.xlane.xlu0 %116 }
 0x1e0   :  { %v120_v46 = vadd.f32 %v117_v45, %v112_v43 }
 0x1e1   :  { %v130_v48 = vld [vmem:[#allocation3 + $0x8] sm:$0xff]  ;;  %v137_v56 = vld [vmem:[#allocation4] sm:$0xff] }
 0x1e2   :  { %122 = vst.msk [vmem:[#allocation5] sm:$0xff] %vm44_vm0, %v120_v46  ;;  %196 = vlog2.f32 %v130_v48 }
 0x1e3   :  { %v119_v49 = vpop.xlane.xlu0 %118 }
 0x1e4   :  { %v121_v50 = vadd.f32 %v119_v49, %v113_v47 }
 0x1e5   :  { %v138_v62 = vld [vmem:[#allocation4 + $0x8] sm:$0xff] }
 0x1e6   :  { %123 = vst.msk [vmem:[#allocation5 + $0x8] sm:$0xff] %vm44_vm0, %v121_v50 }
 0x1e8   :  { %v195_v51 = vpop.eup %194 }
 0x1e9   :  { %v132_v52 = vmul.f32 0.6931472, %v195_v51  ;;  %v141_v60 = vld [vmem:[#allocation5] sm:$0xff] }
 0x1eb   :  { %v135_v54 = vadd.f32 %v132_v52, %v127_v53 }
 0x1ec   :  { %v197_v55 = vpop.eup %196 }
 0x1ed   :  { %v134_v57 = vmul.f32 0.6931472, %v197_v55  ;;  %v139_v58 = vmul.f32 %v137_v56, %v135_v54  ;;  %v142_v63 = vld [vmem:[#allocation5 + $0x8] sm:$0xff] }
 0x1ef   :  { %v136_v61 = vadd.f32 %v134_v57, %v128_v59  ;;  %v143_v1 = vsub.f32 %v139_v58, %v141_v60 }
 0x1f1   :  { %v140_v0 = vmul.f32 %v138_v62, %v136_v61  ;;  %v145_v3 = vsel %vm44_vm0, %v143_v1, 0.0 }
 0x1f3   :  { %v144_v2 = vsub.f32 %v140_v0, %v142_v63 }
 0x1f5   :  { %v146_v4 = vsel %vm44_vm0, %v144_v2, 0.0 }
 0x1f6   :  { %v147_v5 = vadd.f32 %v146_v4, %v145_v3 }
 0x1f8   :  { %148 = vadd.xlane.f32.xlu0 %v147_v5 }
 0x285   :  { %v149_v6 = vpop.xlane.xlu0 %148 }
 0x286   :  { %v150_v7 = vrot.slane %v149_v6, 4 }
 0x288   :  { %v151_v8 = vadd.f32 %v150_v7, %v149_v6 }
 0x28a   :  { %v152_v9 = vrot.slane %v151_v8, 2 }
 0x28c   :  { %v153_v10 = vadd.f32 %v152_v9, %v151_v8 }
 0x28e   :  { %v154_v11 = vrot.slane %v153_v10, 1 }
 0x290   :  { %v155_v12 = vadd.f32 %v154_v11, %v153_v10 }
 0x292   :  { %174 = vpush %v155_v12 }
 0x2c3   :  { %s175_s1 = spop %174 }
 0x2c4   :  { %158 = sst [smem:[#allocation11]] %s175_s1 }
 0x2c5   :  { %251 = shalt.err (!%p248_p4)
}
 0x2c6   :  { %s265_s13 = smov [#allocation11]  }
 0x2c7   :  { %166 = dma.smem_to_hbm %s265_s13, 16, %s337_s2, [#allocation8]  }
 0x2c8   :  { %256 = dma.done.wait [#allocation8], 16  }
 0x2c9   :  { %257 = vsyncadd [#allocation8], 4294967280 }
 0x2ca   :  { %170 = sfence }
 0x2cb   :  { %171 = vsyncpa [#allocation7], 1 }
 0x2cc   :  { %172 = vsyncpa [#allocation10], 1 }
 0x2cd   :  { %173 = vsyncpa [#allocation8], 1 }

</bundles_post_ra>
